<compile_context>
chip_gen: v6e
topology: v6e:2x2x1
jax: 0.10.0
libtpu: 0.0.40
codegen_flags: <defaults>
</compile_context>

<pallas_src>
import jax
import jax.numpy as jnp
from jax.experimental import pallas as pl
from jax.experimental.pallas import tpu as pltpu


def _matmul_kernel(x_ref, w_ref, o_ref):
    # x_ref: (tm, tk) bf16, w_ref: (tk, tn) bf16 (pre-transposed weight),
    # o_ref: (tm, tn) f32, resident across the k (reduction) grid axis.
    @pl.when(pl.program_id(2) == 0)
    def _():
        o_ref[...] = jnp.zeros_like(o_ref)

    o_ref[...] += jnp.dot(
        x_ref[...], w_ref[...], preferred_element_type=jnp.float32
    )


def _round_up(v, m):
    return ((v + m - 1) // m) * m


def net2_forward(x, w, *, tm_max=256, tn_max=1024, tk_max=1024,
                 compute_dtype=jnp.bfloat16):
    """x: (B, n) float32, w: (c, n) float32 (torch layout) -> (B, c) float32."""
    B, n = x.shape
    c, n2 = w.shape
    assert n == n2, "weight in_features must match x features"

    # ---- tile sizes -------------------------------------------------------
    if B <= 8:
        tm = _round_up(B, 8)                      # tiny batch: one clean block
    else:
        tm = min(tm_max, _round_up(B, 16))        # bf16 sublane packing (16)
    tn = min(tn_max, _round_up(c, 128))           # lane-aligned output tile
    tk = min(tk_max, _round_up(n, 128))           # lane-aligned reduction tile

    grid_m = pl.cdiv(B, tm)
    # v7x megacore: if the parallel (i, j) grid collapsed to a single block
    # and the padded output is wide enough, split the j axis so both
    # TensorCores get work (neutral on single-TC v5e/v6e).
    if grid_m == 1 and _round_up(c, 128) <= tn and _round_up(c, 128) >= 256:
        tn = _round_up(_round_up(c, 128) // 2, 128)

    Cp = _round_up(c, tn)     # lane-dense output / weight N dim
    Kp = _round_up(n, tk)     # reduction dim MUST be zero-padded

    # ---- operand prep (wrapper-side, one-time) ----------------------------
    # x: pad only along K (zeros are semantically required for the reduction);
    # the batch axis stays ragged and is handled by masked edge blocks.
    xp = x if Kp == n else jnp.pad(x, ((0, 0), (0, Kp - n)))
    xp = xp.astype(compute_dtype)

    # w: static, small -> pad and pre-transpose once to (Kp, Cp) so the kernel
    # never needs an in-kernel transpose of the weight tile.
    wp = w if (Cp == c and Kp == n) else jnp.pad(w, ((0, Cp - c), (0, Kp - n)))
    wt = wp.T.astype(compute_dtype)               # (Kp, Cp)

    grid = (grid_m, Cp // tn, Kp // tk)

    out = pl.pallas_call(
        _matmul_kernel,
        out_shape=jax.ShapeDtypeStruct((B, Cp), jnp.float32),
        grid_spec=pltpu.PrefetchScalarGridSpec(
            num_scalar_prefetch=0,
            grid=grid,
            in_specs=[
                pl.BlockSpec((tm, tk), lambda i, j, k: (i, k)),
                pl.BlockSpec((tk, tn), lambda i, j, k: (k, j)),
            ],
            out_specs=pl.BlockSpec((tm, tn), lambda i, j, k: (i, j)),
        ),
        compiler_params=pltpu.CompilerParams(
            dimension_semantics=("parallel", "parallel", "arbitrary"),
            vmem_limit_bytes=48 * 1024 * 1024,
        ),
        cost_estimate=pl.CostEstimate(
            flops=2 * B * Kp * Cp,
            transcendentals=0,
            bytes_accessed=2 * (B * Kp + Kp * Cp) + 4 * B * Cp,
        ),
    )(xp, wt)

    if Cp == c:
        return out
    return out[:, :c]


def init_linear_weight(key, c, n):
    # Match torch.nn.Linear default init: U(-1/sqrt(fan_in), 1/sqrt(fan_in))
    bound = 1.0 / jnp.sqrt(jnp.float32(n))
    return jax.random.uniform(
        key, (c, n), dtype=jnp.float32, minval=-bound, maxval=bound
    )


if __name__ == "__main__":
    # Small shapes consistent with Net2(n, bn, c): batch=8, n=256 (as in spec), c=16.
    # NOTE: at this size the kernel is a single grid step and launch/DMA bound;
    # the tiling/bf16/megacore logic above pays off at larger B / c / n.
    B, n, c = 8, 256, 16
    key = jax.random.PRNGKey(0)
    kx, kw = jax.random.split(key)

    x = jax.random.normal(kx, (B, n), dtype=jnp.float32)
    w = init_linear_weight(kw, c, n)

    out = net2_forward(x, w)
    out = jax.block_until_ready(out)

    # sanity check against plain-JAX f32 reference (bf16 operands -> looser tol)
    ref = x @ w.T
    assert out.shape == (B, c)
    assert jnp.allclose(out, ref, atol=2e-2, rtol=2e-2)

    print("KERNEL_OK")
</pallas_src>

<mosaic_0001>
module attributes {stable_mosaic.version = 11 : i64} {
  func.func @_matmul_kernel(%arg0: i32, %arg1: i32, %arg2: i32, %arg3: memref<8x256xbf16, #tpu.memory_space<vmem>>, %arg4: memref<256x128xbf16, #tpu.memory_space<vmem>>, %arg5: memref<8x128xf32, #tpu.memory_space<vmem>>) attributes {dimension_semantics = [#tpu.dimension_semantics<parallel>, #tpu.dimension_semantics<parallel>, #tpu.dimension_semantics<arbitrary>], iteration_bounds = array<i64: 1, 1, 1>, scalar_prefetch = 0 : i64, scratch_operands = 0 : i64, tpu.core_type = #tpu.core_type<tc>, window_params = [{transform_indices = @transform_0, window_bounds = array<i64: 8, 256>}, {transform_indices = @transform_1, window_bounds = array<i64: 256, 128>}, {transform_indices = @transform_2, window_bounds = array<i64: 8, 128>}]} {
    %c0_i32 = arith.constant 0 : i32
    %0 = arith.cmpi eq, %arg2, %c0_i32 : i32
    %1 = arith.extui %0 : i1 to i32
    %c0_i32_0 = arith.constant 0 : i32
    %2 = arith.cmpi ne, %1, %c0_i32_0 : i32
    scf.if %2 {
      %cst_8 = arith.constant 0.000000e+00 : f32
      %9 = vector.broadcast %cst_8 : f32 to vector<8x128xf32>
      %c0_9 = arith.constant 0 : index
      %c0_10 = arith.constant 0 : index
      %10 = vector.load %arg5[%c0_9, %c0_10] : memref<8x128xf32, #tpu.memory_space<vmem>>, vector<8x128xf32>
      tpu.vector_store %arg5[%c0_9, %c0_10], %9 {strides = array<i32>} : memref<8x128xf32, #tpu.memory_space<vmem>>, vector<8x128xf32>,
    } else {
    }
    %c0 = arith.constant 0 : index
    %c0_1 = arith.constant 0 : index
    %3 = vector.load %arg5[%c0, %c0_1] : memref<8x128xf32, #tpu.memory_space<vmem>>, vector<8x128xf32>
    %c0_2 = arith.constant 0 : index
    %c0_3 = arith.constant 0 : index
    %4 = vector.load %arg3[%c0_2, %c0_3] : memref<8x256xbf16, #tpu.memory_space<vmem>>, vector<8x256xbf16>
    %c0_4 = arith.constant 0 : index
    %c0_5 = arith.constant 0 : index
    %5 = vector.load %arg4[%c0_4, %c0_5] : memref<256x128xbf16, #tpu.memory_space<vmem>>, vector<256x128xbf16>
    %cst = arith.constant dense<0.000000e+00> : vector<8x128xf32>
    %6 = tpu.matmul %4, %5, %cst {dimension_numbers = #tpu.dot_dimension_numbers<[1], [0], [0], [1], [0, 0, 1, 1], [], []>} : vector<8x256xbf16>, vector<256x128xbf16>, vector<8x128xf32> -> vector<8x128xf32>
    %7 = arith.addf %3, %6 : vector<8x128xf32>
    %c0_6 = arith.constant 0 : index
    %c0_7 = arith.constant 0 : index
    %8 = vector.load %arg5[%c0_6, %c0_7] : memref<8x128xf32, #tpu.memory_space<vmem>>, vector<8x128xf32>
    tpu.vector_store %arg5[%c0_6, %c0_7], %7 {strides = array<i32>} : memref<8x128xf32, #tpu.memory_space<vmem>>, vector<8x128xf32>,
    return
  }
  func.func @transform_0(%arg0: i32, %arg1: i32, %arg2: i32) -> (i32, i32) {
    %c0_i32 = arith.constant 0 : i32
    return %arg0, %arg2 : i32, i32
  }
  func.func @transform_1(%arg0: i32, %arg1: i32, %arg2: i32) -> (i32, i32) {
    %c0_i32 = arith.constant 0 : i32
    return %arg2, %arg1 : i32, i32
  }
  func.func @transform_2(%arg0: i32, %arg1: i32, %arg2: i32) -> (i32, i32) {
    %c0_i32 = arith.constant 0 : i32
    return %arg0, %arg1 : i32, i32
  }
}

</mosaic_0001>

<bundles_post_ra>
// kernel: tpu_custom_call.1
= control target key start
LH: loop header
LB: loop body
LE: loop exit
PB: predicated region body
PF: predicated region fallthrough
CT: control target
= control target key end

     0   :  { %7 = vsyncpa [#allocation3], 0  ;;  %s398_s0 = inlined_call_operand.hbm [shape: bf16[8,256], index: 0, kind: input, shape index: {}]   ;;  %s399_s1 = inlined_call_operand.hbm [shape: bf16[256,128], index: 1, kind: input, shape index: {}]   ;;  %s400_s2 = inlined_call_operand.hbm [shape: f32[8,128], index: 2, kind: output, shape index: {}]  }
   0x1   :  { %8 = vsyncpa [#allocation6], 0 }
   0x2   :  { %9 = vsyncpa [#allocation4], 0  ;;  %s369_s9 = smov [#allocation2]   ;;  %s370_s11 = smov [#allocation5]  }
   0x3   :  { %s16_s10 = sshll.u32 %s369_s9, 4  ;;  %s25_s12 = sshll.u32 %s370_s11, 4  ;;  %s17_s10 = int_to_ptr.vmem [resolvable:$true] %s16_s10  ;;  %s26_s12 = int_to_ptr.vmem [resolvable:$true] %s25_s12 }
   0x4   :  { %s311_s13 = scalar_lea.vmem %s17_s10, 128  ;;  %p316_p1 = scmp.lt.s32.totalorder %s17_s10, %s17_s10 }
   0x5   :  { %p312_p0 = scmp.ne.s32.totalorder %s17_s10, %s311_s13  ;;  %p317_p2 = scmp.lt.s32.totalorder %s311_s13, %s311_s13 }
   0x7   :  { %p318_p3 = por %p317_p2, %p316_p1 }
   0x9   :  { %p319_p4 = pnand %p318_p3, %p312_p0 }
   0xb   :  { %322 = shalt.err (!%p319_p4)
}
   0xc   :  { %19 = dma.hbm_to_vmem [thread:$0]  %s398_s0, 128, %s17_s10, [#allocation3]  }
   0xd   :  { %s331_s16 = scalar_lea.vmem %s26_s12, 2048  ;;  %p336_p6 = scmp.lt.s32.totalorder %s26_s12, %s26_s12 }
   0xe   :  { %p332_p5 = scmp.ne.s32.totalorder %s26_s12, %s331_s16  ;;  %p337_p7 = scmp.lt.s32.totalorder %s331_s16, %s331_s16 }
  0x10   :  { %p338_p8 = por %p337_p7, %p336_p6 }
  0x12   :  { %p339_p9 = pnand %p338_p8, %p332_p5 }
  0x14   :  { %342 = shalt.err (!%p339_p9)
}
  0x15   :  { %s371_s17 = smov 64   ;;  %s372_s18 = smov 4  }
  0x16   :  { %31 = dma.hbm_to_vmem [thread:$0]  %s399_s1, 2048, %s26_s12, [#allocation6], %s371_s17, %s371_s17, %s372_s18  }
  0x17   :  { %363 = dma.done.wait [#allocation3], 128  }
  0x18   :  { %364 = vsyncadd [#allocation3], 4294967168 }
  0x19   :  { %365 = dma.done.wait [#allocation6], 2048  }
  0x1a   :  { %366 = vsyncadd [#allocation6], 4294965248  ;;  %v285_v0 = vld [vmem:[#allocation5 + $0x78] sm:$0xff]   ;;  %v287_v2 = vld [vmem:[#allocation5 + $0x70] sm:$0xff]   ;;  %s373_s0 = smov [#allocation7]  }
  0x1b   :  { %v286_v1 = vld [vmem:[#allocation5 + $0x38] sm:$0xff]   ;;  %257 = vmatprep.subr.bf16.mxu0 %v285_v0  ;;  %v288_v3 = vld [vmem:[#allocation5 + $0x30] sm:$0xff]   ;;  %v289_v4 = vld [vmem:[#allocation5 + $0x68] sm:$0xff]   ;;  %s229_s1 = sshll.u32 %s373_s0, 4  ;;  %s230_s1 = int_to_ptr.vmem [resolvable:$true] %s229_s1 }
  0x1c   :  { %258 = vmatpush3.bf16.msra.mxu0 %v286_v1  ;;  %v290_v5 = vld [vmem:[#allocation5 + $0x28] sm:$0xff]   ;;  %v291_v6 = vld [vmem:[#allocation5 + $0x60] sm:$0xff]   ;;  %v293_v8 = vld [vmem:[#allocation5 + $0x58] sm:$0xff]   ;;  %s343_s21 = scalar_lea.vmem %s230_s1, 128  ;;  %p348_p11 = scmp.lt.s32.totalorder %s230_s1, %s230_s1 }
  0x1d   :  { %259 = vmatprep.subr.bf16.mxu0 %v287_v2  ;;  %v292_v7 = vld [vmem:[#allocation5 + $0x20] sm:$0xff]   ;;  %v294_v9 = vld [vmem:[#allocation5 + $0x18] sm:$0xff]   ;;  %v295_v10 = vld [vmem:[#allocation5 + $0x50] sm:$0xff]   ;;  %p344_p10 = scmp.ne.s32.totalorder %s230_s1, %s343_s21  ;;  %p349_p12 = scmp.lt.s32.totalorder %s343_s21, %s343_s21 }
  0x1e   :  { %v45_v11 = vld [vmem:[#allocation2] sm:$0xff]  ;;  %v296_v13 = vld [vmem:[#allocation5 + $0x10] sm:$0xff]   ;;  %v297_v14 = vld [vmem:[#allocation5 + $0x48] sm:$0xff]  }
  0x1f   :  { %v240_v12 = vcombine.high %v45_v11, %v45_v11  ;;  %v298_v15 = vld [vmem:[#allocation5 + $0x8] sm:$0xff]   ;;  %v299_v16 = vld [vmem:[#allocation5 + $0x40] sm:$0xff]   ;;  %v239_v18 = vcombine.low %v45_v11, %v45_v11  ;;  %p350_p13 = por %p349_p12, %p348_p11 }
  0x20   :  { %260 = vmatpush3.bf16.msra.mxu0 %v288_v3  ;;  %v300_v17 = vld [vmem:[#allocation5] sm:$0xff]  }
  0x21   :  { %261 = vmatprep.subr.bf16.mxu0 %v289_v4  ;;  %213 = vmatprep.mubr.bf16.mxu0 %v240_v12  ;;  %p351_p0 = pnand %p350_p13, %p344_p10 }
  0x24   :  { %262 = vmatpush3.bf16.msra.mxu0 %v290_v5 }
  0x25   :  { %263 = vmatprep.subr.bf16.mxu0 %v291_v6 }
  0x28   :  { %264 = vmatpush3.bf16.msra.mxu0 %v292_v7 }
  0x29   :  { %265 = vmatprep.subr.bf16.mxu0 %v293_v8 }
  0x2c   :  { %266 = vmatpush3.bf16.msra.mxu0 %v294_v9 }
  0x2d   :  { %267 = vmatprep.subr.bf16.mxu0 %v295_v10 }
  0x30   :  { %268 = vmatpush3.bf16.msra.mxu0 %v296_v13 }
  0x31   :  { %269 = vmatprep.subr.bf16.mxu0 %v297_v14 }
  0x34   :  { %270 = vmatpush3.bf16.msra.mxu0 %v298_v15 }
  0x35   :  { %271 = vmatprep.subr.bf16.mxu0 %v299_v16 }
  0x38   :  { %272 = vmatpush3.bf16.msra.mxu0 %v300_v17 }
  0x3b   :  { %214 = vmatmul.mubr.bf16.vlgmr.msra.gmra.mxu0 %v239_v18 }
  0xfb   :  { %v273_v19 = vpop.f32.mrf.mxu0 }
  0xfd   :  { %v274_v20 = vpop.f32.mrf.mxu0 }
  0xfe   :  { %v275_v21 = vadd.f32 %v274_v20, %v273_v19 }
  0xff   :  { %v276_v22 = vpop.f32.mrf.mxu0 }
 0x100   :  { %222 = vst [vmem:[#allocation7] sm:$0xff] %v275_v21 }
 0x101   :  { %v277_v23 = vpop.f32.mrf.mxu0 }
 0x102   :  { %354 = shalt.err (!%p351_p0)
}
 0x103   :  { %232 = dma.vmem_to_hbm [thread:$0]  %s230_s1, 128, %s400_s2, [#allocation4]  }
 0x104   :  { %367 = dma.done.wait [#allocation4], 128  }
 0x105   :  { %368 = vsyncadd [#allocation4], 4294967168 }
 0x106   :  { %236 = vsyncpa [#allocation3], 1 }
 0x107   :  { %237 = vsyncpa [#allocation6], 1 }
 0x108   :  { %238 = vsyncpa [#allocation4], 1 }

</bundles_post_ra>
